<compile_context>
chip_gen: v6e
topology: v6e:2x2x1
jax: 0.10.0
libtpu: 0.0.40
codegen_flags: <defaults>
</compile_context>

<pallas_src>
import jax
import jax.numpy as jnp
import numpy as np
from jax.experimental import pallas as pl
from jax.experimental.pallas import tpu as pltpu


def _round_up(x, m):
    return ((x + m - 1) // m) * m


def _make_kernel(BN, Dp, FC_PAD, LIN_PAD, FUSED, CLS_PAD, bias_r0, pool_r0, pool_rows, wcls_r0):
    """Single-invocation kernel over the flattened (B*N, Dp) encoder output."""

    def kernel(enc_ref, slab_ref, pred_ref, cls_ref):
        enc = enc_ref[...]                                          # (BN, Dp)

        # Static slices of the packed parameter slab (tile-aligned except the
        # tiny (pool_rows, BN) pooling block, which is ~1 KB).
        w_fused = slab_ref[0:Dp, 0:FUSED]                           # (Dp, FC_PAD+LIN_PAD)
        b_blk = slab_ref[bias_r0:bias_r0 + 8, :]                    # (8, C)
        p_blk = slab_ref[pool_r0:pool_r0 + pool_rows, 0:BN]         # (Bp, BN)
        w_cls = slab_ref[wcls_r0:wcls_r0 + LIN_PAD, 0:CLS_PAD]      # (LIN_PAD, CLS_PAD)

        # One fused MXU GEMM for fc + lin (shared LHS). Columns:
        #   [0, FC_PAD)          -> fc output (zero-padded past n_pred)
        #   [FC_PAD, FUSED)      -> lin output (zero-padded past D)
        out = jnp.dot(enc, w_fused, preferred_element_type=jnp.float32)
        out = out + b_blk[0:1, 0:FUSED]

        # Lane-dense pred slab: full FC_PAD lanes, unmasked stores.
        pred_ref[...] = out[:, 0:FC_PAD].astype(pred_ref.dtype)

        # h = relu(lin(enc)) at a tile-aligned LIN_PAD lane width.
        h = jnp.maximum(out[:, FC_PAD:FUSED], 0.0)                  # (BN, LIN_PAD)

        # pooled = block_diag(pool_w) @ h : one tiny MXU pass (MXU otherwise idle),
        # rows padded to a full sublane tile so downstream stores are unmasked.
        pooled = jnp.dot(p_blk, h, preferred_element_type=jnp.float32)   # (Bp, LIN_PAD)

        # classify (pool bias pre-folded into the classify bias at prepack time).
        cls = jnp.dot(pooled, w_cls, preferred_element_type=jnp.float32)
        cls = cls + b_blk[1:2, 0:CLS_PAD]
        cls_ref[...] = cls.astype(cls_ref.dtype)

    return kernel


def prepack_classification_params(params, B, N, dtype=jnp.float32):
    """One-time packing of all weights/biases into a single lane-aligned slab.

    Call once; reuse the result across every forward call (the per-call path then
    contains no pad/scatter/transpose HBM ops).
    """
    fc_w = jnp.asarray(params["fc_w"], dtype)     # (n_pred, D)
    fc_b = jnp.asarray(params["fc_b"], dtype)     # (n_pred,)
    lin_w = jnp.asarray(params["lin_w"], dtype)   # (D, D)
    lin_b = jnp.asarray(params["lin_b"], dtype)   # (D,)
    pool_w = jnp.asarray(params["pool_w"], dtype)  # (1, N)
    pool_b = jnp.asarray(params["pool_b"], dtype)  # (1,)
    cls_w = jnp.asarray(params["cls_w"], dtype)   # (n_cls, D)
    cls_b = jnp.asarray(params["cls_b"], dtype)   # (n_cls,)

    n_pred, D = fc_w.shape
    n_cls = cls_w.shape[0]
    assert lin_w.shape == (D, D)
    assert pool_w.shape == (1, N)

    BN = B * N
    Dp = _round_up(D, 8)
    Bp = _round_up(B, 8)
    FC_PAD = _round_up(n_pred, 128)
    LIN_PAD = _round_up(D, 128)
    FUSED = FC_PAD + LIN_PAD
    CLS_PAD = _round_up(n_cls, 256)     # 2 full 256-lane MXU passes (v6e/v7x); fine on v5e
    C = max(FUSED, CLS_PAD)

    bias_r0 = Dp
    pool_r0 = Dp + 8
    wcls_r0 = pool_r0 + Bp
    R = wcls_r0 + LIN_PAD

    slab = jnp.zeros((R, C), dtype)
    # Fused fc + lin RHS (shared LHS).
    slab = slab.at[:D, :n_pred].set(fc_w.T)
    slab = slab.at[:D, FC_PAD:FC_PAD + D].set(lin_w.T)
    # Biases. Pool bias folded into classify bias:
    #   classify = (pooled_nb + pool_b) @ Wc^T + bc = pooled_nb @ Wc^T + (bc + pool_b * Wc.sum(1))
    slab = slab.at[bias_r0, :n_pred].set(fc_b)
    slab = slab.at[bias_r0, FC_PAD:FC_PAD + D].set(lin_b)
    bcls_fold = cls_b + pool_b[0] * cls_w.sum(axis=1)
    slab = slab.at[bias_r0 + 1, :n_cls].set(bcls_fold)
    # Block-diagonal pooling matrix (one-time, B is small).
    for b in range(B):
        slab = slab.at[pool_r0 + b, b * N:(b + 1) * N].set(pool_w[0])
    # Classify weights.
    slab = slab.at[wcls_r0:wcls_r0 + D, :n_cls].set(cls_w.T)

    meta = dict(B=B, N=N, D=D, Dp=Dp, Bp=Bp, BN=BN, n_pred=n_pred, n_cls=n_cls,
                FC_PAD=FC_PAD, LIN_PAD=LIN_PAD, FUSED=FUSED, CLS_PAD=CLS_PAD,
                bias_r0=bias_r0, pool_r0=pool_r0, wcls_r0=wcls_r0)
    return {"slab": slab, "meta": meta}


def classification_forward(enc, packed):
    """enc: (B, N, D) float32. Returns (pred (B, N, n_pred), classify (B, 288))."""
    meta = packed["meta"]
    B, N, D = meta["B"], meta["N"], meta["D"]
    assert enc.shape == (B, N, D), f"expected {(B, N, D)}, got {enc.shape}"
    Dp, Bp, BN = meta["Dp"], meta["Bp"], meta["BN"]
    FC_PAD, LIN_PAD, FUSED, CLS_PAD = (meta["FC_PAD"], meta["LIN_PAD"],
                                       meta["FUSED"], meta["CLS_PAD"])

    enc_flat = enc.reshape(BN, D)
    if Dp != D:  # only pads lanes when D is not a sublane multiple (no-op here)
        enc_flat = jnp.pad(enc_flat, ((0, 0), (0, Dp - D)))

    slab = packed["slab"]
    kernel = _make_kernel(BN, Dp, FC_PAD, LIN_PAD, FUSED, CLS_PAD,
                          meta["bias_r0"], meta["pool_r0"], Bp, meta["wcls_r0"])

    flops = (2 * BN * Dp * FUSED) + (2 * Bp * BN * LIN_PAD) + (2 * Bp * LIN_PAD * CLS_PAD)
    bytes_accessed = 4 * (BN * Dp + slab.size + BN * FC_PAD + Bp * CLS_PAD)

    pred_slab, cls_slab = pl.pallas_call(
        kernel,
        out_shape=(
            jax.ShapeDtypeStruct((BN, FC_PAD), enc.dtype),
            jax.ShapeDtypeStruct((Bp, CLS_PAD), enc.dtype),
        ),
        in_specs=[pl.BlockSpec(memory_space=pltpu.MemorySpace.VMEM),
                  pl.BlockSpec(memory_space=pltpu.MemorySpace.VMEM)],
        out_specs=(pl.BlockSpec(memory_space=pltpu.MemorySpace.VMEM),
                   pl.BlockSpec(memory_space=pltpu.MemorySpace.VMEM)),
        cost_estimate=pl.CostEstimate(flops=flops, transcendentals=0,
                                      bytes_accessed=bytes_accessed),
    )(enc_flat, slab)

    pred = pred_slab[:, :meta["n_pred"]].reshape(B, N, meta["n_pred"])
    classify = cls_slab[:B, :meta["n_cls"]]
    # NOTE: PyTorch's .squeeze() would also drop the batch dim when B == 1; we
    # always return (B, n_cls) for a stable shape contract.
    return pred, classify


def _reference_forward(enc, params):
    pred = enc @ params["fc_w"].T + params["fc_b"]
    h = jnp.maximum(enc @ params["lin_w"].T + params["lin_b"], 0.0)          # (B, N, D)
    pooled = jnp.einsum("bnd,n->bd", h, params["pool_w"][0]) + params["pool_b"][0]
    classify = pooled @ params["cls_w"].T + params["cls_b"]
    return pred, classify


if __name__ == "__main__":
    # Small config consistent with the module: enc_dim=32, n_pred=8, num_nodes=16.
    B, N, D, N_PRED, N_CLS = 2, 16, 32, 8, 288

    key = jax.random.PRNGKey(0)
    keys = jax.random.split(key, 9)
    enc = jax.random.normal(keys[0], (B, N, D), dtype=jnp.float32)

    params = {
        "fc_w": 0.1 * jax.random.normal(keys[1], (N_PRED, D), jnp.float32),
        "fc_b": 0.1 * jax.random.normal(keys[2], (N_PRED,), jnp.float32),
        "lin_w": 0.1 * jax.random.normal(keys[3], (D, D), jnp.float32),
        "lin_b": 0.1 * jax.random.normal(keys[4], (D,), jnp.float32),
        "pool_w": 0.1 * jax.random.normal(keys[5], (1, N), jnp.float32),
        "pool_b": 0.1 * jax.random.normal(keys[6], (1,), jnp.float32),
        "cls_w": 0.1 * jax.random.normal(keys[7], (N_CLS, D), jnp.float32),
        "cls_b": 0.1 * jax.random.normal(keys[8], (N_CLS,), jnp.float32),
    }

    # One-time prepack (hoisted out of the per-call path), then a jitted steady-state
    # forward that only reshapes enc and launches the 2-operand Pallas kernel.
    packed = prepack_classification_params(params, B, N)
    jax.block_until_ready(packed["slab"])
    forward = jax.jit(lambda e: classification_forward(e, packed))

    pred, classify = forward(enc)
    jax.block_until_ready((pred, classify))

    ref_pred, ref_cls = _reference_forward(enc, params)
    np.testing.assert_allclose(np.asarray(pred), np.asarray(ref_pred),
                               rtol=1e-4, atol=1e-5)
    np.testing.assert_allclose(np.asarray(classify), np.asarray(ref_cls),
                               rtol=1e-4, atol=1e-5)

    assert pred.shape == (B, N, N_PRED) and classify.shape == (B, N_CLS)
    print("KERNEL_OK")
</pallas_src>

<mosaic_0001>
module attributes {stable_mosaic.version = 11 : i64} {
  func.func @kernel(%arg0: memref<32x32xf32, #tpu.memory_space<vmem>>, %arg1: memref<176x512xf32, #tpu.memory_space<vmem>>, %arg2: memref<32x128xf32, #tpu.memory_space<vmem>>, %arg3: memref<8x512xf32, #tpu.memory_space<vmem>>) attributes {dimension_semantics = [], scalar_prefetch = 0 : i64, scratch_operands = 0 : i64, tpu.core_type = #tpu.core_type<tc>} {
    %c0 = arith.constant 0 : index
    %c0_0 = arith.constant 0 : index
    %0 = vector.load %arg0[%c0, %c0_0] : memref<32x32xf32, #tpu.memory_space<vmem>>, vector<32x32xf32>
    %c0_1 = arith.constant 0 : index
    %c0_2 = arith.constant 0 : index
    %1 = vector.load %arg1[%c0_1, %c0_2] : memref<176x512xf32, #tpu.memory_space<vmem>>, vector<32x256xf32>
    %c32 = arith.constant 32 : index
    %c0_3 = arith.constant 0 : index
    %2 = vector.load %arg1[%c32, %c0_3] : memref<176x512xf32, #tpu.memory_space<vmem>>, vector<8x512xf32>
    %c40 = arith.constant 40 : index
    %c0_4 = arith.constant 0 : index
    %3 = vector.load %arg1[%c40, %c0_4] : memref<176x512xf32, #tpu.memory_space<vmem>>, vector<8x32xf32>
    %c48 = arith.constant 48 : index
    %c0_5 = arith.constant 0 : index
    %4 = vector.load %arg1[%c48, %c0_5] : memref<176x512xf32, #tpu.memory_space<vmem>>, vector<128x512xf32>
    %cst = arith.constant dense<0.000000e+00> : vector<32x256xf32>
    %5 = tpu.matmul %0, %1, %cst {dimension_numbers = #tpu.dot_dimension_numbers<[1], [0], [0], [1], [0, 0, 1, 1], [], []>} : vector<32x32xf32>, vector<32x256xf32>, vector<32x256xf32> -> vector<32x256xf32>
    %6 = vector.extract_strided_slice %2 {offsets = [0, 0], sizes = [1, 256], strides = [1, 1]} : vector<8x512xf32> to vector<1x256xf32>
    %7 = vector.broadcast %6 : vector<1x256xf32> to vector<32x256xf32>
    %8 = arith.addf %5, %7 : vector<32x256xf32>
    %9 = vector.extract_strided_slice %8 {offsets = [0, 0], sizes = [32, 128], strides = [1, 1]} : vector<32x256xf32> to vector<32x128xf32>
    %c0_6 = arith.constant 0 : index
    %c0_7 = arith.constant 0 : index
    %10 = vector.load %arg2[%c0_6, %c0_7] : memref<32x128xf32, #tpu.memory_space<vmem>>, vector<32x128xf32>
    tpu.vector_store %arg2[%c0_6, %c0_7], %9 {strides = array<i32>} : memref<32x128xf32, #tpu.memory_space<vmem>>, vector<32x128xf32>,
    %11 = vector.extract_strided_slice %8 {offsets = [0, 128], sizes = [32, 128], strides = [1, 1]} : vector<32x256xf32> to vector<32x128xf32>
    %cst_8 = arith.constant 0.000000e+00 : f32
    %12 = vector.broadcast %cst_8 : f32 to vector<32x128xf32>
    %13 = arith.maximumf %11, %12 : vector<32x128xf32>
    %cst_9 = arith.constant dense<0.000000e+00> : vector<8x128xf32>
    %14 = tpu.matmul %3, %13, %cst_9 {dimension_numbers = #tpu.dot_dimension_numbers<[1], [0], [0], [1], [0, 0, 1, 1], [], []>} : vector<8x32xf32>, vector<32x128xf32>, vector<8x128xf32> -> vector<8x128xf32>
    %cst_10 = arith.constant dense<0.000000e+00> : vector<8x512xf32>
    %15 = tpu.matmul %14, %4, %cst_10 {dimension_numbers = #tpu.dot_dimension_numbers<[1], [0], [0], [1], [0, 0, 1, 1], [], []>} : vector<8x128xf32>, vector<128x512xf32>, vector<8x512xf32> -> vector<8x512xf32>
    %16 = vector.extract_strided_slice %2 {offsets = [1, 0], sizes = [1, 512], strides = [1, 1]} : vector<8x512xf32> to vector<1x512xf32>
    %17 = vector.broadcast %16 : vector<1x512xf32> to vector<8x512xf32>
    %18 = arith.addf %15, %17 : vector<8x512xf32>
    %c0_11 = arith.constant 0 : index
    %c0_12 = arith.constant 0 : index
    %19 = vector.load %arg3[%c0_11, %c0_12] : memref<8x512xf32, #tpu.memory_space<vmem>>, vector<8x512xf32>
    tpu.vector_store %arg3[%c0_11, %c0_12], %18 {strides = array<i32>} : memref<8x512xf32, #tpu.memory_space<vmem>>, vector<8x512xf32>,
    return
  }
}

</mosaic_0001>

<bundles_post_ra>
// kernel: _lambda_.1
= control target key start
LH: loop header
LB: loop body
LE: loop exit
PB: predicated region body
PF: predicated region fallthrough
CT: control target
= control target key end

     0   :  { %9 = vsyncpa [#allocation3], 0  ;;  %s644_s0 = inlined_call_operand.hbm [shape: f32[32,32], index: 0, kind: input, shape index: {}]   ;;  %s645_s1 = inlined_call_operand.hbm [shape: f32[176,512], index: 1, kind: input, shape index: {}]   ;;  %s646_s2 = inlined_call_operand.vmem [shape: f32[32,128], index: 2, kind: output, shape index: {0}]   ;;  %s647_s3 = inlined_call_operand.vmem [shape: f32[8,512], index: 3, kind: output, shape index: {1}]  }
   0x1   :  { %10 = vsyncpa [#allocation5], 0  ;;  %s558_s12 = smov [#allocation2]  }
   0x2   :  { %s16_s13 = sshll.u32 %s558_s12, 4  ;;  %s17_s13 = int_to_ptr.vmem [resolvable:$true] %s16_s13 }
   0x3   :  { %s522_s14 = scalar_lea.vmem %s17_s13, 512  ;;  %p527_p1 = scmp.lt.s32.totalorder %s17_s13, %s17_s13 }
   0x4   :  { %p523_p0 = scmp.ne.s32.totalorder %s17_s13, %s522_s14  ;;  %p528_p2 = scmp.lt.s32.totalorder %s522_s14, %s522_s14 }
   0x6   :  { %p529_p3 = por %p528_p2, %p527_p1 }
   0x8   :  { %p530_p4 = pnand %p529_p3, %p523_p0 }
   0xa   :  { %533 = shalt.err (!%p530_p4)
}
   0xb   :  { %s559_s15 = smov 128   ;;  %s560_s16 = smov 8  }
   0xc   :  { %22 = dma.hbm_to_vmem [thread:$0]  %s644_s0, 512, %s17_s13, [#allocation3], %s559_s15, %s559_s15, %s560_s16  }
   0xd   :  { %s561_s19 = smov [#allocation4]  }
   0xe   :  { %s28_s20 = sshll.u32 %s561_s19, 4  ;;  %s29_s20 = int_to_ptr.vmem [resolvable:$true] %s28_s20 }
   0xf   :  { %s542_s21 = scalar_lea.vmem %s29_s20, 11264  ;;  %p547_p6 = scmp.lt.s32.totalorder %s29_s20, %s29_s20 }
  0x10   :  { %p543_p5 = scmp.ne.s32.totalorder %s29_s20, %s542_s21  ;;  %p548_p7 = scmp.lt.s32.totalorder %s542_s21, %s542_s21 }
  0x12   :  { %p549_p8 = por %p548_p7, %p547_p6 }
  0x14   :  { %p550_p9 = pnand %p549_p8, %p543_p5 }
  0x16   :  { %553 = shalt.err (!%p550_p9)
}
  0x17   :  { %s562_s22 = smov 512   ;;  %s563_s23 = smov 32  }
  0x18   :  { %34 = dma.hbm_to_vmem [thread:$0]  %s645_s1, 11264, %s29_s20, [#allocation5], %s562_s22, %s562_s22, %s563_s23  }
  0x19   :  { %554 = dma.done.wait [#allocation3], 512  }
  0x1a   :  { %555 = vsyncadd [#allocation3], 4294966784 }
  0x1b   :  { %556 = dma.done.wait [#allocation5], 11264  }
  0x1c   :  { %557 = vsyncadd [#allocation5], 4294956032  ;;  %v564_v0 = vmov 0.0   ;;  %v52_v1 = vld [vmem:[#allocation4 + $0x68] sm:$0xff]  ;;  %v51_v2 = vld [vmem:[#allocation4 + $0x60] sm:$0xff]  ;;  %vm130_vm0 = vcmask 261120   ;;  %v122_v44 = vlaneseq }
  0x1d   :  { %207 = vmatprep.mubr.f32.mxu0 %v564_v0  ;;  %495 = vmatprep.subr.mxu1 %v564_v0  ;;  %v50_v3 = vld [vmem:[#allocation4 + $0x48] sm:$0xff]  ;;  %v49_v4 = vld [vmem:[#allocation4 + $0x40] sm:$0xff]  ;;  %v43_v11 = vld [vmem:[#allocation2 + $0x10] sm:$0xff]  ;;  %vm565_vm1 = vmmov 0  }
  0x1e   :  { %167 = vmatprep.subr.mxu0 %v52_v1  ;;  %v48_v5 = vld [vmem:[#allocation4 + $0x28] sm:$0xff]  ;;  %v47_v6 = vld [vmem:[#allocation4 + $0x20] sm:$0xff]  ;;  %v44_v12 = vld [vmem:[#allocation2 + $0x18] sm:$0xff]  ;;  %503 = vmatprep.mubr.msk.f32.mxu1 %vm565_vm1, %v564_v0  ;;  %v603_v45 = vshrl.u32 %v122_v44, 7 }
  0x1f   :  { %168 = vmatpush1.msra.mxu0 %v51_v2  ;;  %v46_v7 = vld [vmem:[#allocation4 + $0x8] sm:$0xff]  ;;  %v45_v8 = vld [vmem:[#allocation4] sm:$0xff]  ;;  %v55_v44 = vld [vmem:[#allocation4 + $0x90] sm:$0xff] }
  0x20   :  { %169 = vmatprep.subr.mxu0 %v50_v3  ;;  %v41_v9 = vld [vmem:[#allocation2] sm:$0xff]  ;;  %v42_v10 = vld [vmem:[#allocation2 + $0x8] sm:$0xff]  ;;  %v124_v46 = vsub.s32 0, %v603_v45 }
  0x21   :  { %170 = vmatpush1.msra.mxu0 %v49_v4  ;;  %v119_v13 = vld [vmem:[#allocation4 + $0x2a8] sm:$0xff]  ;;  %v118_v14 = vld [vmem:[#allocation4 + $0x2a0] sm:$0xff] }
  0x22   :  { %171 = vmatprep.subr.mxu0 %v48_v5  ;;  %v115_v15 = vld [vmem:[#allocation4 + $0x288] sm:$0xff]  ;;  %v114_v16 = vld [vmem:[#allocation4 + $0x280] sm:$0xff] }
  0x23   :  { %172 = vmatpush1.msra.mxu0 %v47_v6  ;;  %v111_v17 = vld [vmem:[#allocation4 + $0x268] sm:$0xff]  ;;  %v110_v18 = vld [vmem:[#allocation4 + $0x260] sm:$0xff] }
  0x24   :  { %173 = vmatprep.subr.mxu0 %v46_v7  ;;  %v107_v19 = vld [vmem:[#allocation4 + $0x248] sm:$0xff]  ;;  %v106_v20 = vld [vmem:[#allocation4 + $0x240] sm:$0xff] }
  0x25   :  { %174 = vmatpush1.msra.mxu0 %v45_v8  ;;  %v103_v21 = vld [vmem:[#allocation4 + $0x228] sm:$0xff]  ;;  %v102_v22 = vld [vmem:[#allocation4 + $0x220] sm:$0xff] }
  0x26   :  { %485 = vmatmul.mubr.msk.f32.vlgmr.msra.gmra.mxu0 %vm130_vm0, %v41_v9  ;;  %329 = vmatprep.subr.mxu0 %v119_v13  ;;  %v99_v23 = vld [vmem:[#allocation4 + $0x208] sm:$0xff]  ;;  %v98_v24 = vld [vmem:[#allocation4 + $0x200] sm:$0xff]  ;;  %v121_v9 = vld [vmem:[#allocation4 + $0x2b8] sm:$0xff] }
  0x27   :  { %213 = vmatprep.mubr.f32.mxu0 %v564_v0  ;;  %330 = vmatpush1.msra.mxu0 %v118_v14  ;;  %v95_v25 = vld [vmem:[#allocation4 + $0x1e8] sm:$0xff]  ;;  %v94_v26 = vld [vmem:[#allocation4 + $0x1e0] sm:$0xff]  ;;  %v113_v13 = vld [vmem:[#allocation4 + $0x278] sm:$0xff] }
  0x28   :  { %331 = vmatprep.subr.mxu0 %v115_v15  ;;  %v91_v27 = vld [vmem:[#allocation4 + $0x1c8] sm:$0xff]  ;;  %v90_v28 = vld [vmem:[#allocation4 + $0x1c0] sm:$0xff]  ;;  %v112_v14 = vld [vmem:[#allocation4 + $0x270] sm:$0xff] }
  0x29   :  { %332 = vmatpush1.msra.mxu0 %v114_v16  ;;  %v87_v29 = vld [vmem:[#allocation4 + $0x1a8] sm:$0xff]  ;;  %v86_v30 = vld [vmem:[#allocation4 + $0x1a0] sm:$0xff]  ;;  %v109_v15 = vld [vmem:[#allocation4 + $0x258] sm:$0xff] }
  0x2a   :  { %486 = vmatmul.mubr.msk.f32.gmra.mxu0 %vm130_vm0, %v42_v10  ;;  %333 = vmatprep.subr.mxu0 %v111_v17  ;;  %v83_v31 = vld [vmem:[#allocation4 + $0x188] sm:$0xff]  ;;  %v82_v32 = vld [vmem:[#allocation4 + $0x180] sm:$0xff]  ;;  %v120_v10 = vld [vmem:[#allocation4 + $0x2b0] sm:$0xff] }
  0x2b   :  { %219 = vmatprep.mubr.f32.mxu0 %v564_v0  ;;  %334 = vmatpush1.msra.mxu0 %v110_v18  ;;  %v79_v33 = vld [vmem:[#allocation4 + $0x168] sm:$0xff]  ;;  %v78_v34 = vld [vmem:[#allocation4 + $0x160] sm:$0xff]  ;;  %v108_v16 = vld [vmem:[#allocation4 + $0x250] sm:$0xff] }
  0x2c   :  { %335 = vmatprep.subr.mxu0 %v107_v19  ;;  %v75_v35 = vld [vmem:[#allocation4 + $0x148] sm:$0xff]  ;;  %v74_v36 = vld [vmem:[#allocation4 + $0x140] sm:$0xff]  ;;  %v105_v17 = vld [vmem:[#allocation4 + $0x238] sm:$0xff] }
  0x2d   :  { %336 = vmatpush1.msra.mxu0 %v106_v20  ;;  %v71_v37 = vld [vmem:[#allocation4 + $0x128] sm:$0xff]  ;;  %v70_v38 = vld [vmem:[#allocation4 + $0x120] sm:$0xff]  ;;  %v104_v18 = vld [vmem:[#allocation4 + $0x230] sm:$0xff] }
  0x2e   :  { %487 = vmatmul.mubr.msk.f32.gmra.mxu0 %vm130_vm0, %v43_v11  ;;  %337 = vmatprep.subr.mxu0 %v103_v21  ;;  %v67_v39 = vld [vmem:[#allocation4 + $0x108] sm:$0xff]  ;;  %v66_v40 = vld [vmem:[#allocation4 + $0x100] sm:$0xff]  ;;  %v117_v11 = vld [vmem:[#allocation4 + $0x298] sm:$0xff] }
  0x2f   :  { %225 = vmatprep.mubr.f32.mxu0 %v564_v0  ;;  %338 = vmatpush1.msra.mxu0 %v102_v22  ;;  %v63_v41 = vld [vmem:[#allocation4 + $0xe8] sm:$0xff]  ;;  %v62_v42 = vld [vmem:[#allocation4 + $0xe0] sm:$0xff]  ;;  %v101_v19 = vld [vmem:[#allocation4 + $0x218] sm:$0xff] }
  0x30   :  { %339 = vmatprep.subr.mxu0 %v99_v23  ;;  %v59_v43 = vld [vmem:[#allocation4 + $0xc8] sm:$0xff]  ;;  %v606_v47 = vld [vmem:[#allocation4 + $0x80] sm:$0xff]  ;;  %v100_v20 = vld [vmem:[#allocation4 + $0x210] sm:$0xff] }
  0x31   :  { %340 = vmatpush1.msra.mxu0 %v98_v24  ;;  %v125_v48 = vrot.slane %v606_v47, %v124_v46  ;;  %v615_v57 = vld [vmem:[#allocation4 + $0x88] sm:$0xff]  ;;  %v57_v8 = vld [vmem:[#allocation4 + $0xa0] sm:$0xff]  ;;  %v97_v21 = vld [vmem:[#allocation4 + $0x1f8] sm:$0xff] }
  0x32   :  { %488 = vmatmul.mubr.msk.f32.gmra.mxu0 %vm130_vm0, %v44_v12  ;;  %341 = vmatprep.subr.mxu0 %v95_v25  ;;  %v129_v60 = vrot.slane %v615_v57, %v124_v46  ;;  %v116_v12 = vld [vmem:[#allocation4 + $0x290] sm:$0xff]  ;;  %v89_v24 = vld [vmem:[#allocation4 + $0x1b8] sm:$0xff] }
  0x33   :  { %393 = vmatprep.mubr.f32.mxu0 %v564_v0  ;;  %342 = vmatpush1.msra.mxu0 %v94_v26  ;;  %v96_v22 = vld [vmem:[#allocation4 + $0x1f0] sm:$0xff]  ;;  %v85_v26 = vld [vmem:[#allocation4 + $0x198] sm:$0xff] }
  0x34   :  { %343 = vmatprep.subr.mxu0 %v91_v27  ;;  %v92_v23 = vld [vmem:[#allocation4 + $0x1d0] sm:$0xff]  ;;  %v56_v46 = vld [vmem:[#allocation4 + $0x98] sm:$0xff] }
  0x35   :  { %344 = vmatpush1.msra.mxu0 %v90_v28  ;;  %v88_v25 = vld [vmem:[#allocation4 + $0x1b0] sm:$0xff]  ;;  %v81_v28 = vld [vmem:[#allocation4 + $0x178] sm:$0xff] }
  0x36   :  { %345 = vmatprep.subr.mxu0 %v87_v29  ;;  %v84_v27 = vld [vmem:[#allocation4 + $0x190] sm:$0xff] }
  0x37   :  { %346 = vmatpush1.msra.mxu0 %v86_v30  ;;  %v80_v29 = vld [vmem:[#allocation4 + $0x170] sm:$0xff]  ;;  %v77_v30 = vld [vmem:[#allocation4 + $0x158] sm:$0xff] }
  0x38   :  { %347 = vmatprep.subr.mxu0 %v83_v31  ;;  %v76_v31 = vld [vmem:[#allocation4 + $0x150] sm:$0xff] }
  0x39   :  { %348 = vmatpush1.msra.mxu0 %v82_v32  ;;  %v73_v32 = vld [vmem:[#allocation4 + $0x138] sm:$0xff] }
  0x3a   :  { %349 = vmatprep.subr.mxu0 %v79_v33  ;;  %v72_v33 = vld [vmem:[#allocation4 + $0x130] sm:$0xff] }
  0x3b   :  { %350 = vmatpush1.msra.mxu0 %v78_v34  ;;  %v69_v34 = vld [vmem:[#allocation4 + $0x118] sm:$0xff] }
  0x3c   :  { %351 = vmatprep.subr.mxu0 %v75_v35  ;;  %v68_v35 = vld [vmem:[#allocation4 + $0x110] sm:$0xff] }
  0x3d   :  { %352 = vmatpush1.msra.mxu0 %v74_v36  ;;  %v65_v36 = vld [vmem:[#allocation4 + $0xf8] sm:$0xff] }
  0x3e   :  { %353 = vmatprep.subr.mxu0 %v71_v37  ;;  %v64_v37 = vld [vmem:[#allocation4 + $0xf0] sm:$0xff] }
  0x3f   :  { %354 = vmatpush1.msra.mxu0 %v70_v38  ;;  %v61_v38 = vld [vmem:[#allocation4 + $0xd8] sm:$0xff] }
  0x40   :  { %355 = vmatprep.subr.mxu0 %v67_v39  ;;  %v58_v39 = vld [vmem:[#allocation4 + $0xc0] sm:$0xff] }
  0x41   :  { %356 = vmatpush1.msra.mxu0 %v66_v40  ;;  %v60_v40 = vld [vmem:[#allocation4 + $0xd0] sm:$0xff] }
  0x42   :  { %357 = vmatprep.subr.mxu0 %v63_v41 }
  0x43   :  { %358 = vmatpush1.msra.mxu0 %v62_v42 }
  0x44   :  { %359 = vmatprep.subr.mxu0 %v59_v43  ;;  %v315_v43 = vsub.s32 1, %v603_v45 }
  0x45   :  { %360 = vmatpush1.msra.mxu0 %v58_v39 }
  0xe6   :  { %v209_v49 = vpop.f32.mrf.mxu0 }
  0xe7   :  { %v210_v50 = vadd.f32 %v209_v49, %v125_v48  ;;  %v324_v49 = vrot.slane %v55_v44, %v315_v43 }
  0xe8   :  { %v211_v51 = vpop.f32.mrf.mxu0 }
  0xe9   :  { %232 = vst [vmem:[%s646_s2] sm:$0xff] %v210_v50  ;;  %v212_v4 = vadd.f32 %v211_v51, %v129_v60  ;;  %v320_v50 = vrot.slane %v615_v57, %v315_v43  ;;  %v328_v51 = vrot.slane %v56_v46, %v315_v43 }
  0xea   :  { %v215_v52 = vpop.f32.mrf.mxu0 }
  0xeb   :  { %v216_v53 = vadd.f32 %v215_v52, %v125_v48  ;;  %v236_v7 = vmax.f32 %v212_v4, 0.0 }
  0xec   :  { %v217_v54 = vpop.f32.mrf.mxu0 }
  0xed   :  { %233 = vst [vmem:[%s646_s2 + $0x8] sm:$0xff] %v216_v53  ;;  %v218_v2 = vadd.f32 %v217_v54, %v129_v60 }
  0xee   :  { %v221_v55 = vpop.f32.mrf.mxu0 }
  0xef   :  { %v222_v56 = vadd.f32 %v221_v55, %v125_v48  ;;  %v237_v6 = vmax.f32 %v218_v2, 0.0 }
  0xf0   :  { %v223_v58 = vpop.f32.mrf.mxu0 }
  0xf1   :  { %234 = vst [vmem:[%s646_s2 + $0x10] sm:$0xff] %v222_v56  ;;  %v224_v63 = vadd.f32 %v223_v58, %v129_v60 }
  0xf2   :  { %v227_v59 = vpop.f32.mrf.mxu0 }
  0xf3   :  { %v228_v61 = vadd.f32 %v227_v59, %v125_v48  ;;  %v238_v5 = vmax.f32 %v224_v63, 0.0  ;;  %v316_v48 = vrot.slane %v606_v47, %v315_v43 }
  0xf4   :  { %v229_v62 = vpop.f32.mrf.mxu0 }
  0xf5   :  { %235 = vst [vmem:[%s646_s2 + $0x18] sm:$0xff] %v228_v61  ;;  %v230_v1 = vadd.f32 %v229_v62, %v129_v60 }
  0xf7   :  { %v239_v3 = vmax.f32 %v230_v1, 0.0 }
  0xf9   :  { %496 = vmatpush3.msra.mxu1 %v239_v3 }
  0xfa   :  { %497 = vmatprep.subr.mxu1 %v564_v0 }
  0xfb   :  { %498 = vmatpush3.msra.mxu1 %v238_v5 }
  0xfc   :  { %499 = vmatprep.subr.mxu1 %v564_v0 }
  0xfd   :  { %500 = vmatpush3.msra.mxu1 %v237_v6 }
  0xfe   :  { %501 = vmatprep.subr.mxu1 %v564_v0 }
  0xff   :  { %502 = vmatpush3.msra.mxu1 %v236_v7 }
 0x100   :  { %504 = vmatmul.mubr.msk.f32.vlgmr.msra.gmra.mxu1 %vm130_vm0, %v57_v8  ;;  %400 = vmatprep.subr.mxu1 %v121_v9 }
 0x101   :  { %401 = vmatpush1.msra.mxu1 %v120_v10  ;;  %464 = vmatprep.mubr.f32.mxu1 %v564_v0  ;;  %v93_v0 = vld [vmem:[#allocation4 + $0x1d8] sm:$0xff] }
 0x102   :  { %402 = vmatprep.subr.mxu1 %v117_v11 }
 0x103   :  { %403 = vmatpush1.msra.mxu1 %v116_v12 }
 0x104   :  { %404 = vmatprep.subr.mxu1 %v113_v13 }
 0x105   :  { %405 = vmatpush1.msra.mxu1 %v112_v14 }
 0x106   :  { %406 = vmatprep.subr.mxu1 %v109_v15 }
 0x107   :  { %407 = vmatpush1.msra.mxu1 %v108_v16 }
 0x108   :  { %408 = vmatprep.subr.mxu1 %v105_v17 }
 0x109   :  { %409 = vmatpush1.msra.mxu1 %v104_v18 }
 0x10a   :  { %410 = vmatprep.subr.mxu1 %v101_v19 }
 0x10b   :  { %411 = vmatpush1.msra.mxu1 %v100_v20 }
 0x10c   :  { %412 = vmatprep.subr.mxu1 %v97_v21 }
 0x10d   :  { %413 = vmatpush1.msra.mxu1 %v96_v22 }
 0x10e   :  { %414 = vmatprep.subr.mxu1 %v93_v0 }
 0x10f   :  { %415 = vmatpush1.msra.mxu1 %v92_v23 }
 0x110   :  { %416 = vmatprep.subr.mxu1 %v89_v24 }
 0x111   :  { %417 = vmatpush1.msra.mxu1 %v88_v25 }
 0x112   :  { %418 = vmatprep.subr.mxu1 %v85_v26 }
 0x113   :  { %419 = vmatpush1.msra.mxu1 %v84_v27 }
 0x114   :  { %420 = vmatprep.subr.mxu1 %v81_v28 }
 0x115   :  { %421 = vmatpush1.msra.mxu1 %v80_v29 }
 0x116   :  { %422 = vmatprep.subr.mxu1 %v77_v30 }
 0x117   :  { %423 = vmatpush1.msra.mxu1 %v76_v31 }
 0x118   :  { %424 = vmatprep.subr.mxu1 %v73_v32 }
 0x119   :  { %425 = vmatpush1.msra.mxu1 %v72_v33 }
 0x11a   :  { %426 = vmatprep.subr.mxu1 %v69_v34 }
 0x11b   :  { %427 = vmatpush1.msra.mxu1 %v68_v35 }
 0x11c   :  { %428 = vmatprep.subr.mxu1 %v65_v36 }
 0x11d   :  { %429 = vmatpush1.msra.mxu1 %v64_v37 }
 0x11e   :  { %430 = vmatprep.subr.mxu1 %v61_v38 }
 0x11f   :  { %431 = vmatpush1.msra.mxu1 %v60_v40 }
 0x1c0   :  { %v309_v41 = vpop.f32.mrf.mxu1 }
 0x1c1   :  { %394 = vmatmul.mubr.f32.vlgmr.msra.gmra.mxu0 %v309_v41  ;;  %465 = vmatmul.mubr.f32.vlgmr.msra.gmra.mxu1 %v309_v41 }
 0x1c2   :  { %v505_v42 = vpop.f32.mrf.mxu1 }
 0x281   :  { %v395_v52 = vpop.f32.mrf.mxu0  ;;  %v466_v53 = vpop.f32.mrf.mxu1 }
 0x282   :  { %v396_v54 = vadd.f32 %v395_v52, %v316_v48  ;;  %v467_v55 = vadd.f32 %v466_v53, %v324_v49 }
 0x283   :  { %v397_v56 = vpop.f32.mrf.mxu0  ;;  %v468_v58 = vpop.f32.mrf.mxu1 }
 0x284   :  { %471 = vst [vmem:[%s647_s3] sm:$0xff] %v396_v54  ;;  %473 = vst [vmem:[%s647_s3 + $0x10] sm:$0xff] %v467_v55  ;;  %v398_v45 = vadd.f32 %v397_v56, %v320_v50  ;;  %v469_v47 = vadd.f32 %v468_v58, %v328_v51 }
 0x286   :  { %472 = vst [vmem:[%s647_s3 + $0x8] sm:$0xff] %v398_v45  ;;  %474 = vst [vmem:[%s647_s3 + $0x18] sm:$0xff] %v469_v47 }
 0x287   :  { %483 = vsyncpa [#allocation3], 1 }
 0x288   :  { %484 = vsyncpa [#allocation5], 1 }

</bundles_post_ra>
